<compile_context>
chip_gen: v5e
topology: v5e:2x2
jax: 0.10.0
libtpu: 0.0.40
codegen_flags: <defaults>
</compile_context>

<pallas_src>
import functools

import jax
import jax.numpy as jnp
from jax import lax
from jax.experimental import pallas as pl
from jax.experimental.pallas import tpu as pltpu


# ----------------------------- tiling helpers --------------------------------

_VMEM_TILE_BUDGET_BYTES = 40 * 1024 * 1024   # working set for double-buffered tiles
_VMEM_LIMIT_BYTES = 48 * 1024 * 1024         # safely below v7x's 64 MiB VMEM / TC


def _round_up(v, m):
    return ((v + m - 1) // m) * m


def _sublane_multiple(dtype):
    # Sub-32-bit dtypes pack rows along sublanes: 8 rows f32, 16 bf16, 32 int8.
    return max(8, 32 // jnp.dtype(dtype).itemsize)


def _pick_tile(n_rows, features, dtype, num_row_streams, resident_bytes=0):
    """VMEM-budget-aware token tile (rows): sublane-aligned, prefers >=2 grid steps."""
    sub = _sublane_multiple(dtype)
    row_bytes = features * jnp.dtype(dtype).itemsize
    budget = max(0, _VMEM_TILE_BUDGET_BYTES - resident_bytes)
    # Every row-tiled stream is double-buffered by the BlockSpec pipeline.
    budget_rows = budget // max(1, row_bytes * num_row_streams * 2)
    tile = min(1024, max(sub, budget_rows))
    tile -= tile % sub
    # Keep >= 2 grid steps so megacore sharding / DMA-compute overlap kick in.
    if tile >= n_rows and n_rows > sub:
        tile = _round_up(-(-n_rows // 2), sub)
    return max(sub, tile)


def _pad_rows(x2d, n_pad):
    n = x2d.shape[0]
    return x2d if n == n_pad else jnp.pad(x2d, ((0, n_pad - n), (0, 0)))


# ----------------------------- kernels ---------------------------------------


def _layernorm_kernel(x_ref, gamma_ref, beta_ref, out_ref, *, eps):
    # x_ref: (tile, F); gamma/beta: (1, F); out_ref: (tile, F)
    x = x_ref[...].astype(jnp.float32)
    inv_f = 1.0 / x.shape[-1]
    mean = jnp.sum(x, axis=-1, keepdims=True) * inv_f
    mean_sq = jnp.sum(x * x, axis=-1, keepdims=True) * inv_f
    var = mean_sq - mean * mean                     # biased variance (torch LN)
    inv = lax.rsqrt(var + eps)                      # EUP slot
    y = (x - mean) * inv * gamma_ref[...] + beta_ref[...]
    out_ref[...] = y.astype(out_ref.dtype)


def _ln_linear_relu_residual_kernel(x_ref, gamma_ref, beta_ref, w_ref, b_ref,
                                    out_ref, *, eps):
    # Fused: out = x + relu(LayerNorm(x) @ W + b).  `normed` stays in VMEM/vregs.
    x = x_ref[...].astype(jnp.float32)
    inv_f = 1.0 / x.shape[-1]
    mean = jnp.sum(x, axis=-1, keepdims=True) * inv_f
    mean_sq = jnp.sum(x * x, axis=-1, keepdims=True) * inv_f
    var = mean_sq - mean * mean
    inv = lax.rsqrt(var + eps)
    normed = (x - mean) * inv * gamma_ref[...] + beta_ref[...]
    h = jnp.dot(normed.astype(w_ref.dtype), w_ref[...],
                preferred_element_type=jnp.float32)          # MXU
    h = jnp.maximum(h + b_ref[...], 0.0)
    out_ref[...] = (x + h).astype(out_ref.dtype)


# ----------------------------- wrappers ---------------------------------------


def layernorm_2d(x2d, gamma, beta, *, eps=1e-5):
    """x2d: (N, F); gamma, beta: (F,) -> (N, F) LayerNorm via Pallas."""
    N, F = x2d.shape
    dtype = x2d.dtype
    itemsize = jnp.dtype(dtype).itemsize
    tile = _pick_tile(N, F, dtype, num_row_streams=2)
    n_tiles = pl.cdiv(N, tile)
    n_pad = n_tiles * tile
    xp = _pad_rows(x2d, n_pad)

    gamma2 = gamma.reshape(1, F).astype(jnp.float32)
    beta2 = beta.reshape(1, F).astype(jnp.float32)

    out = pl.pallas_call(
        functools.partial(_layernorm_kernel, eps=eps),
        out_shape=jax.ShapeDtypeStruct((n_pad, F), dtype),
        grid_spec=pl.GridSpec(
            grid=(n_tiles,),
            in_specs=[
                pl.BlockSpec((tile, F), lambda i: (i, 0)),   # x token tile
                pl.BlockSpec((1, F), lambda i: (0, 0)),      # gamma (broadcast)
                pl.BlockSpec((1, F), lambda i: (0, 0)),      # beta  (broadcast)
            ],
            out_specs=pl.BlockSpec((tile, F), lambda i: (i, 0)),
        ),
        compiler_params=pltpu.CompilerParams(
            dimension_semantics=("parallel",),
            vmem_limit_bytes=_VMEM_LIMIT_BYTES),
        cost_estimate=pl.CostEstimate(
            flops=8 * n_pad * F,
            transcendentals=n_pad,
            bytes_accessed=2 * n_pad * F * itemsize + 2 * F * 4),
    )(xp, gamma2, beta2)
    return out[:N] if n_pad != N else out


def sublayer_connect(x, sublayer, gamma, beta, *, eps=1e-5):
    """Generic path: x + sublayer(LayerNorm(x)) with an arbitrary JAX `sublayer`.

    The residual add is intentionally plain JAX so XLA fuses it into the
    sublayer's epilogue instead of paying an extra mem-bound Pallas pass.
    """
    shape = x.shape
    F = shape[-1]
    x2d = x.reshape(-1, F)
    normed = layernorm_2d(x2d, gamma, beta, eps=eps)
    # TODO(synk): arbitrary user-supplied sublayers cannot be fused generically
    # into the Pallas kernel; they run as plain JAX here.
    sub_out = sublayer(normed.reshape(shape))
    return x + sub_out


def sublayer_connect_fused_linear_relu(x, w, bias, gamma, beta, *, eps=1e-5):
    """Fused fast path (known sublayer = linear+ReLU): one Pallas kernel doing
    LN -> matmul -> bias/ReLU -> residual add.  Valid when w is (F, F)."""
    shape = x.shape
    F = shape[-1]
    assert w.shape == (F, F) and bias.shape == (F,)
    x2d = x.reshape(-1, F)
    N = x2d.shape[0]
    dtype = x2d.dtype
    itemsize = jnp.dtype(dtype).itemsize

    w_bytes = 2 * w.size * jnp.dtype(w.dtype).itemsize      # W may be double-buffered
    tile = _pick_tile(N, F, dtype, num_row_streams=2, resident_bytes=w_bytes)
    n_tiles = pl.cdiv(N, tile)
    n_pad = n_tiles * tile
    xp = _pad_rows(x2d, n_pad)

    gamma2 = gamma.reshape(1, F).astype(jnp.float32)
    beta2 = beta.reshape(1, F).astype(jnp.float32)
    bias2 = bias.reshape(1, F).astype(jnp.float32)

    out = pl.pallas_call(
        functools.partial(_ln_linear_relu_residual_kernel, eps=eps),
        out_shape=jax.ShapeDtypeStruct((n_pad, F), dtype),
        grid_spec=pl.GridSpec(
            grid=(n_tiles,),
            in_specs=[
                pl.BlockSpec((tile, F), lambda i: (i, 0)),   # x token tile
                pl.BlockSpec((1, F), lambda i: (0, 0)),      # gamma
                pl.BlockSpec((1, F), lambda i: (0, 0)),      # beta
                pl.BlockSpec((F, F), lambda i: (0, 0)),      # W (same block each step)
                pl.BlockSpec((1, F), lambda i: (0, 0)),      # bias
            ],
            out_specs=pl.BlockSpec((tile, F), lambda i: (i, 0)),
        ),
        compiler_params=pltpu.CompilerParams(
            dimension_semantics=("parallel",),
            vmem_limit_bytes=_VMEM_LIMIT_BYTES),
        cost_estimate=pl.CostEstimate(
            flops=2 * n_pad * F * F + 12 * n_pad * F,
            transcendentals=n_pad,
            bytes_accessed=2 * n_pad * F * itemsize
                           + (F * F + 3 * F) * jnp.dtype(w.dtype).itemsize),
    )(xp, gamma2, beta2, w, bias2)
    out = out[:N] if n_pad != N else out
    return out.reshape(shape)


# ----------------------------- demo / check ----------------------------------


if __name__ == "__main__":
    batch, seq, features = 2, 8, 128   # features multiple of 128 -> lane-dense stores
    eps = 1e-5

    key = jax.random.PRNGKey(0)
    kx, kg, kb, kw, kwb = jax.random.split(key, 5)

    x = jax.random.normal(kx, (batch, seq, features), dtype=jnp.float32)
    gamma = 1.0 + 0.1 * jax.random.normal(kg, (features,), dtype=jnp.float32)
    beta = 0.1 * jax.random.normal(kb, (features,), dtype=jnp.float32)

    # Demo sublayer: linear + ReLU (stands in for the arbitrary `sublayer`).
    W = jax.random.normal(kw, (features, features), dtype=jnp.float32) / jnp.sqrt(
        float(features))
    bias = 0.1 * jax.random.normal(kwb, (features,), dtype=jnp.float32)
    sublayer = lambda h: jax.nn.relu(jnp.dot(h, W) + bias)

    # Generic path (Pallas LN + plain-JAX sublayer + XLA-fused residual add).
    out_generic = jax.block_until_ready(
        sublayer_connect(x, sublayer, gamma, beta, eps=eps))

    # Fused fast path (single Pallas kernel).
    out_fused = jax.block_until_ready(
        sublayer_connect_fused_linear_relu(x, W, bias, gamma, beta, eps=eps))

    # Pure-JAX reference: x + sublayer(LayerNorm(x)).
    mean = jnp.mean(x, axis=-1, keepdims=True)
    var = jnp.mean((x - mean) ** 2, axis=-1, keepdims=True)
    x_norm = (x - mean) / jnp.sqrt(var + eps) * gamma + beta
    ref = x + sublayer(x_norm)

    assert out_generic.shape == (batch, seq, features)
    assert out_fused.shape == (batch, seq, features)
    assert jnp.allclose(out_generic, ref, atol=1e-4, rtol=1e-5), "generic path mismatch"
    assert jnp.allclose(out_fused, ref, atol=1e-4, rtol=1e-5), "fused path mismatch"

    print("KERNEL_OK")
</pallas_src>

<mosaic_0001>
module attributes {stable_mosaic.version = 11 : i64} {
  func.func @_layernorm_kernel(%arg0: i32, %arg1: memref<8x128xf32, #tpu.memory_space<vmem>>, %arg2: memref<1x128xf32, #tpu.memory_space<vmem>>, %arg3: memref<1x128xf32, #tpu.memory_space<vmem>>, %arg4: memref<8x128xf32, #tpu.memory_space<vmem>>) attributes {dimension_semantics = [#tpu.dimension_semantics<parallel>], iteration_bounds = array<i64: 2>, scalar_prefetch = 0 : i64, scratch_operands = 0 : i64, tpu.core_type = #tpu.core_type<tc>, window_params = [{transform_indices = @transform_0, window_bounds = array<i64: 8, 128>}, {pipeline_mode = #tpu.pipeline_mode<synchronous>, transform_indices = @transform_1, window_bounds = array<i64: 1, 128>}, {pipeline_mode = #tpu.pipeline_mode<synchronous>, transform_indices = @transform_2, window_bounds = array<i64: 1, 128>}, {transform_indices = @transform_3, window_bounds = array<i64: 8, 128>}]} {
    %c0 = arith.constant 0 : index
    %c0_0 = arith.constant 0 : index
    %0 = vector.load %arg1[%c0, %c0_0] : memref<8x128xf32, #tpu.memory_space<vmem>>, vector<8x128xf32>
    %cst = arith.constant dense<0.000000e+00> : vector<8xf32>
    %1 = vector.multi_reduction <add>, %0, %cst [1] : vector<8x128xf32> to vector<8xf32>
    %2 = vector.shape_cast %1 : vector<8xf32> to vector<8x1xf32>
    %cst_1 = arith.constant 7.812500e-03 : f32
    %3 = vector.broadcast %cst_1 : f32 to vector<8x1xf32>
    %4 = arith.mulf %2, %3 : vector<8x1xf32>
    %5 = arith.mulf %0, %0 : vector<8x128xf32>
    %cst_2 = arith.constant dense<0.000000e+00> : vector<8xf32>
    %6 = vector.multi_reduction <add>, %5, %cst_2 [1] : vector<8x128xf32> to vector<8xf32>
    %7 = vector.shape_cast %6 : vector<8xf32> to vector<8x1xf32>
    %cst_3 = arith.constant 7.812500e-03 : f32
    %8 = vector.broadcast %cst_3 : f32 to vector<8x1xf32>
    %9 = arith.mulf %7, %8 : vector<8x1xf32>
    %10 = arith.mulf %4, %4 : vector<8x1xf32>
    %11 = arith.subf %9, %10 : vector<8x1xf32>
    %cst_4 = arith.constant 9.99999974E-6 : f32
    %12 = vector.broadcast %cst_4 : f32 to vector<8x1xf32>
    %13 = arith.addf %11, %12 : vector<8x1xf32>
    %14 = math.rsqrt %13 : vector<8x1xf32>
    %15 = vector.broadcast %4 : vector<8x1xf32> to vector<8x128xf32>
    %16 = arith.subf %0, %15 : vector<8x128xf32>
    %17 = vector.broadcast %14 : vector<8x1xf32> to vector<8x128xf32>
    %18 = arith.mulf %16, %17 : vector<8x128xf32>
    %c0_5 = arith.constant 0 : index
    %c0_6 = arith.constant 0 : index
    %19 = vector.load %arg2[%c0_5, %c0_6] : memref<1x128xf32, #tpu.memory_space<vmem>>, vector<1x128xf32>
    %20 = vector.broadcast %19 : vector<1x128xf32> to vector<8x128xf32>
    %21 = arith.mulf %18, %20 : vector<8x128xf32>
    %c0_7 = arith.constant 0 : index
    %c0_8 = arith.constant 0 : index
    %22 = vector.load %arg3[%c0_7, %c0_8] : memref<1x128xf32, #tpu.memory_space<vmem>>, vector<1x128xf32>
    %23 = vector.broadcast %22 : vector<1x128xf32> to vector<8x128xf32>
    %24 = arith.addf %21, %23 : vector<8x128xf32>
    %c0_9 = arith.constant 0 : index
    %c0_10 = arith.constant 0 : index
    %25 = vector.load %arg4[%c0_9, %c0_10] : memref<8x128xf32, #tpu.memory_space<vmem>>, vector<8x128xf32>
    tpu.vector_store %arg4[%c0_9, %c0_10], %24 {strides = array<i32>} : memref<8x128xf32, #tpu.memory_space<vmem>>, vector<8x128xf32>,
    return
  }
  func.func @transform_0(%arg0: i32) -> (i32, i32) {
    %c0_i32 = arith.constant 0 : i32
    %c0_i32_0 = arith.constant 0 : i32
    return %arg0, %c0_i32 : i32, i32
  }
  func.func @transform_1(%arg0: i32) -> (i32, i32) {
    %c0_i32 = arith.constant 0 : i32
    %c0_i32_0 = arith.constant 0 : i32
    %c0_i32_1 = arith.constant 0 : i32
    return %c0_i32, %c0_i32_0 : i32, i32
  }
  func.func @transform_2(%arg0: i32) -> (i32, i32) {
    %c0_i32 = arith.constant 0 : i32
    %c0_i32_0 = arith.constant 0 : i32
    %c0_i32_1 = arith.constant 0 : i32
    return %c0_i32, %c0_i32_0 : i32, i32
  }
  func.func @transform_3(%arg0: i32) -> (i32, i32) {
    %c0_i32 = arith.constant 0 : i32
    %c0_i32_0 = arith.constant 0 : i32
    return %arg0, %c0_i32 : i32, i32
  }
}

</mosaic_0001>

<bundles_post_ra>
// kernel: tpu_custom_call.1
= control target key start
LH: loop header
LB: loop body
LE: loop exit
PB: predicated region body
PF: predicated region fallthrough
CT: control target
= control target key end

     0   :  { %8 = vsyncpa [#allocation3], 0  ;;  %s706_s0 = inlined_call_operand.hbm [shape: f32[16,128], index: 0, kind: input, shape index: {}]   ;;  %s707_s1 = inlined_call_operand.hbm [shape: f32[1,128], index: 1, kind: input, shape index: {}]   ;;  %s708_s2 = inlined_call_operand.vmem [shape: f32[1,128], index: 2, kind: input, shape index: {}]   ;;  %s709_s3 = inlined_call_operand.hbm [shape: f32[16,128], index: 3, kind: output, shape index: {}]  }
   0x1   :  { %10 = vsyncpa [#allocation3 + $0x1], 0 }
   0x2   :  { %11 = vsyncpa [#allocation6], 0 }
   0x3   :  { %12 = vsyncpa [#allocation4], 0 }
   0x4   :  { %14 = vsyncpa [#allocation4 + $0x1], 0  ;;  %s561_s12 = smov 0   ;;  %s563_s13 = smov 0  }
   0x5   :  { %s565_s14 = smov 0   ;;  %s567_s15 = smov 0  }
   0x6 LB: > { %s582_s16 = sadd.s32 4294967295, %s538_s15   ;;  %s333_s17 = sadd.s32 4294967294, %s538_s15   ;;  %s538_s15 = sphi %s567_s15, %s719_s15   ;;  %s534_s14 = sphi %s565_s14, %s718_s14   ;;  %s530_s13 = sphi %s563_s13, %s717_s13   ;;  %s526_s12 = sphi %s561_s12, %s716_s12  }
   0x7   : > { %p40_p0 = scmp.ne.s32.totalorder %s530_s13, %s526_s12  ;;  %p41_p1 = scmp.eq.s32.totalorder %s582_s16, 0 }
   0x8   : > { %p106_p2 = scmp.eq.s32.totalorder %s582_s16, 1  ;;  %p112_p3 = scmp.eq.s32.totalorder %s333_s17, 1 }
   0x9   : > { %p591_p4 = por %p41_p1, %p40_p0  ;;  %p334_p5 = scmp.ge.s32.totalorder %s538_s15, 1 }
   0xa   : > { %p596_p6 = por %p112_p3, %p40_p0  ;;  %p119_p7 = scmp.lt.s32.totalorder %s538_s15, 3 }
   0xb   : > { %s131_s22 = sshll.u32 %s707_s1, 4  ;;  %s540_s24 = smov [#allocation5]   ;;  %s132_s22 = int_to_ptr.hbm [resolvable:$true] %s131_s22 }
   0xc   : > { %p604_p8 = pnand %p334_p5, %p119_p7  ;;  %s133_s25 = sshll.u32 %s540_s24, 4  ;;  %s134_s25 = int_to_ptr.vmem [resolvable:$true] %s133_s25 }
   0xd   : > { %s614_s26 = sadd.s32 1, %s538_s15   ;;  %s27_s27 = sadd.s32 1, %s534_s14 }
   0xe   : > { %p355_p10 = pneg %p604_p8  ;;  %s24_s28 = ssub.s32 %s538_s15, %s614_s26 }
   0xf   : > { %p25_p12 = scmp.eq.s32.totalorder %s24_s28, 0  ;;  %p34_p13 = scmp.ne.s32.totalorder %s534_s14, %s530_s13 }
  0x10   : > { %p356_p11 = pnand %p355_p10, %p41_p1  ;;  %p35_p0 = scmp.eq.s32.totalorder %s538_s15, 0 }
  0x11   : > { %s623_s29 = scalar_select %p25_p12, %s534_s14, %s27_s27  }
  0x12   : > { %358 = dma.hbm_to_vmem [thread:$0]  (!%p356_p11), %s132_s22, 16, %s134_s25, [#allocation6]  }
  0x13   : > { %p627_p3 = por %p106_p2, %p34_p13  ;;  %p368_p5 = scmp.lt.s32.totalorder %s538_s15, 2 }
  0x14   : > { %s147_s4 = sand.u32 1, %s534_s14   ;;  %s338_s5 = sshll.u32 %s538_s15, 3 }
  0x15   : > { %p36_p7 = por %p35_p0, %p34_p13  ;;  %s337_s6 = sshll.u32 %s147_s4, 3 }
  0x16   : > { %s155_s9 = scalar_lea.hbm %s706_s0, %s338_s5  ;;  %s151_s11 = scalar_lea.vmem [#allocation2], %s337_s6 }
  0x17   : > { %s157_s10 = sshll.u32 %s155_s9, 4  ;;  %s159_s17 = sshll.u32 %s151_s11, 4  ;;  %s158_s10 = int_to_ptr.hbm [resolvable:$true] %s157_s10  ;;  %s160_s17 = int_to_ptr.vmem [resolvable:$true] %s159_s17 }
  0x18   : > { %p637_p10 = pnand %p368_p5, %p36_p7  ;;  %s148_s21 = scalar_lea.sflag [#allocation3], %s147_s4 }
  0x19   : > { %s438_s22 = sshra.s32 %s158_s10, 4  ;;  %s445_s28 = scalar_lea.hbm %s706_s0, 16  ;;  %s439_s22 = int_to_ptr.hbm [resolvable:$true] %s438_s22 }
  0x1a   : > { %s440_s24 = scalar_lea.hbm %s439_s22, 8  ;;  %p442_p11 = pneg %p637_p10 }
  0x1b   : > { %p441_p2 = scmp.ne.s32.totalorder %s439_s22, %s440_s24  ;;  %p446_p0 = scmp.lt.s32.totalorder %s439_s22, %s706_s0 }
  0x1c   : > { %p447_p5 = scmp.lt.s32.totalorder %s445_s28, %s440_s24 }
  0x1d   : > { %p443_p12 = pnand %p442_p11, %p441_p2 }
  0x1e   : > { %p448_p7 = por %p447_p5, %p446_p0 }
  0x1f   : > { %p444_p13 = pneg %p443_p12 }
  0x21   : > { %p449_p9 = pnand %p448_p7, %p444_p13 }
  0x23   : > { %452 = shalt.err (!%p449_p9)
}
  0x24   : > { %362 = dma.hbm_to_vmem [thread:$0]  (!%p637_p10), %s158_s10, 128, %s160_s17, %s148_s21  }
  0x25   : > { %168 = sbr.rel (%p604_p8) target bundleno = 203 (0xcb), region = 32  ;;  %s654_s4 = sand.u32 (!%p604_p8), 1, %s530_s13  }
  0x26   : > { %s340_s7 = sshll.u32 (!%p604_p8), %s654_s4, 3  ;;  %s171_s8 = scalar_lea.sflag (!%p604_p8), [#allocation3], %s654_s4 }
  0x27   : > { %s174_s9 = scalar_lea.vmem (!%p604_p8), [#allocation2], %s340_s7 }
  0x2a   : > { %513 = dma.done.wait (%p591_p4), %s171_s8, 128  }
  0x2b   : > { %515 = vsyncadd (%p591_p4), %s171_s8, 4294967168 }
  0x2c   : > { %517 = dma.done.wait (%p41_p1), [#allocation6], 16  }
  0x2d   : > { %519 = vsyncadd (%p41_p1), [#allocation6], 4294967280  ;;  %v203_v0 = vld [vmem:[%s174_s9] sm:$0xff]  ;;  %s344_s18 = sshll.u32 %s582_s16, 3  ;;  %v404_v16 = vld [vmem:[#allocation5] ss:$0 sm:$0xff] }
  0x2e   : > { %204 = vadd.xlane.f32.xlu0 %v203_v0  ;;  %v207_v1 = vmul.f32 %v203_v0, %v203_v0  ;;  %s248_s11 = scalar_lea.hbm %s709_s3, %s344_s18  ;;  %v405_v19 = vld [vmem:[%s708_s2] ss:$0 sm:$0xff]  ;;  %s202_s21 = scalar_lea.vmem [#allocation7], %s340_s7 }
  0x2f   : > { %s250_s16 = sshll.u32 %s202_s21, 4  ;;  %s252_s22 = sshll.u32 %s248_s11, 4  ;;  %s251_s16 = int_to_ptr.vmem [resolvable:$true] %s250_s16  ;;  %s253_s22 = int_to_ptr.hbm [resolvable:$true] %s252_s22 }
  0x30   : > { %s238_s24 = scalar_lea.sflag [#allocation4], %s654_s4  ;;  %s482_s25 = sshra.s32 %s253_s22, 4  ;;  %s483_s25 = int_to_ptr.hbm [resolvable:$true] %s482_s25 }
  0x31   : > { %s484_s27 = scalar_lea.hbm %s483_s25, 8  ;;  %s488_s6 = scalar_lea.hbm %s709_s3, 16 }
  0x32   : > { %p485_p1 = scmp.ne.s32.totalorder %s483_s25, %s484_s27  ;;  %p489_p9 = scmp.lt.s32.totalorder %s483_s25, %s709_s3 }
  0x33   : > { %p490_p10 = scmp.lt.s32.totalorder %s488_s6, %s484_s27 }
  0x34   : > { %p486_p4 = pnand %p485_p1, %p627_p3 }
  0x35   : > { %p491_p2 = por %p490_p10, %p489_p9 }
  0x36   : > { %208 = vadd.xlane.f32.xlu0 %v207_v1  ;;  %p487_p8 = pneg %p486_p4 }
  0x38   : > { %p492_p11 = pnand %p491_p2, %p487_p8 }
  0xa1   : > { %v205_v2 = vpop.xlane.xlu0 %204 }
  0xa2   : > { %v206_v3 = vmul.f32 0.0078125, %v205_v2 }
  0xa4   : > { %v211_v5 = vmul.f32 %v206_v3, %v206_v3  ;;  %v224_v15 = vsub.f32 %v203_v0, %v206_v3 }
  0xa9   : > { %v209_v4 = vpop.xlane.xlu0 %208 }
  0xaa   : > { %v210_v6 = vmul.f32 0.0078125, %v209_v4 }
  0xac   : > { %v212_v7 = vsub.f32 %v210_v6, %v211_v5 }
  0xae   : > { %v213_v8 = vadd.f32 1e-05, %v212_v7 }
  0xb0   : > { %406 = vrsqrt.f32 %v213_v8  ;;  %vm220_vm1 = vweird.f32 %v213_v8 }
  0xb6   : > { %v407_v9 = vpop.eup %406 }
  0xb7   : > { %v215_v10 = vmul.f32 %v407_v9, %v213_v8  ;;  %vm221_vm0 = vweird.f32 %v407_v9 }
  0xb8   : > { %vm222_vm2 = vmor %vm220_vm1, %vm221_vm0 }
  0xb9   : > { %v216_v11 = vmul.f32 %v407_v9, %v215_v10 }
  0xbb   : > { %v217_v12 = vmul.f32 0.5, %v216_v11 }
  0xbd   : > { %v218_v13 = vsub.f32 1.5, %v217_v12 }
  0xbf   : > { %v219_v14 = vmul.f32 %v407_v9, %v218_v13 }
  0xc1   : > { %v223_v17 = vsel %vm222_vm2, %v407_v9, %v219_v14 }
  0xc2   : > { %v225_v18 = vmul.f32 %v224_v15, %v223_v17 }
  0xc4   : > { %v230_v20 = vmul.f32 %v404_v16, %v225_v18 }
  0xc6   : > { %v235_v21 = vadd.f32 %v405_v19, %v230_v20 }
  0xc8   : > { %236 = vst [vmem:[%s202_s21] sm:$0xff] %v235_v21 }
  0xc9   : > { %495 = shalt.err (!%p492_p11)
}
  0xca   : > { %353 = dma.vmem_to_hbm [thread:$0]  (%p627_p3), %s251_s16, 128, %s253_s22, %s238_s24  }
  0xcb PF: > { %s264_s4 = sand.u32 1, %s526_s12   ;;  %p715_p12 = scmp.ge.s32.totalorder %s538_s15, 2 }
  0xcc   : > { %s265_s9 = scalar_lea.sflag [#allocation4], %s264_s4 }
  0xcd   : > { %p364_p13 = pnand %p715_p12, %p596_p6 }
  0xcf   : > { %p365_p0 = pneg %p364_p13 }
  0xd1   : > { %521 = dma.done.wait (%p365_p0), %s265_s9, 128  }
  0xd2   : > { %523 = vsyncadd (%p365_p0), %s265_s9, 4294967168  ;;  %p17_p5 = scmp.ge.s32.totalorder %s614_s26, 4   ;;  %s716_s12 = smov %s530_s13 }
  0xd3   : > { %s717_s13 = smov %s534_s14  ;;  %s718_s14 = smov %s623_s29 }
  0xd4   : > { %s719_s15 = smov %s614_s26  ;;  %19 = sbr.rel (!%p17_p5) target bundleno = 6 (0x6), region = 81 }
  0xd9   :  { %271 = vsyncpa [#allocation3], 1 }
  0xda   :  { %273 = vsyncpa [#allocation3 + $0x1], 1 }
  0xdb   :  { %274 = vsyncpa [#allocation6], 1 }
  0xdc   :  { %275 = vsyncpa [#allocation4], 1 }
  0xdd   :  { %277 = vsyncpa [#allocation4 + $0x1], 1 }

</bundles_post_ra>
